<compile_context>
chip_gen: v7x
topology: tpu7x:2x2x1
jax: 0.10.0
libtpu: 0.0.40
codegen_flags: <defaults>
</compile_context>

<pallas_src>
import functools

import jax
import jax.numpy as jnp
from jax.experimental import pallas as pl
from jax.experimental.pallas import tpu as pltpu

LRELU_SLOPE = 0.01   # torch nn.LeakyReLU() default
BN_EPS = 1e-5        # torch nn.BatchNorm1d default


def _res_main_kernel(x_ref, s1_ref, sh1_ref, w1_ref, s2_ref, sh2_ref, w2_ref,
                     b2_ref, wd_ref, pooled_ref, sum_ref, v_scr,
                     *, lt, lpt, l_total, use_downsample):
    """Conv stack + residual + MaxPool1d(3) for one (batch, time-tile) step.

    x_ref:      (1, 1, lt+4, Cin)  rows <-> global [base-2, base+lt+2) (halo=2)
    pooled_ref: (1, lpt, Cout)     pooled frames of this tile
    sum_ref:    (1, 1, Cout)       running sum of pooled frames (accumulator)
    v_scr:      (lt, Cout)         VMEM scratch for the stride-3 max pool
    """
    t = pl.program_id(1)
    base = t * lt                       # global index of this tile's first output row

    x = x_ref[0, 0]                     # (lt+4, Cin) f32

    # --- BN1 (folded, eval mode) + LeakyReLU; zero rows outside the sequence
    #     (conv1 'same' zero padding + halo hygiene) ---
    h = x * s1_ref[...] + sh1_ref[...]
    h = jnp.where(h > 0, h, LRELU_SLOPE * h)
    r1 = jax.lax.broadcasted_iota(jnp.int32, (lt + 4, 1), 0) + (base - 2)
    h = jnp.where(jnp.logical_and(r1 >= 0, r1 < l_total), h, 0.0)

    # --- Conv1d(Cin->Cout, k=3, pad=1, no bias): single MXU matmul on an
    #     im2col strip (taps folded into K=3*Cin), bf16 in / f32 accumulate ---
    hcat = jnp.concatenate([h[0:lt + 2], h[1:lt + 3], h[2:lt + 4]], axis=1)
    c1 = jnp.dot(hcat.astype(jnp.bfloat16), w1_ref[...],
                 preferred_element_type=jnp.float32)     # rows <-> [base-1, base+lt+1)

    # --- BN2 (folded) + LeakyReLU; zero out-of-sequence rows (conv2 padding) ---
    g = c1 * s2_ref[...] + sh2_ref[...]
    g = jnp.where(g > 0, g, LRELU_SLOPE * g)
    r2 = jax.lax.broadcasted_iota(jnp.int32, (lt + 2, 1), 0) + (base - 1)
    g = jnp.where(jnp.logical_and(r2 >= 0, r2 < l_total), g, 0.0)

    # --- Conv1d(Cout->Cout, k=3, pad=1, bias) ---
    gcat = jnp.concatenate([g[0:lt], g[1:lt + 1], g[2:lt + 2]], axis=1)
    c2 = jnp.dot(gcat.astype(jnp.bfloat16), w2_ref[...],
                 preferred_element_type=jnp.float32) + b2_ref[...]   # rows <-> [base, base+lt)

    # --- residual: 1x1 downsample only when Cin != Cout, else identity ---
    x_mid = x[2:lt + 2]
    if use_downsample:
        res = jnp.dot(x_mid.astype(jnp.bfloat16), wd_ref[...],
                      preferred_element_type=jnp.float32)
    else:
        res = x_mid
    v_scr[...] = c2 + res

    # --- MaxPool1d(kernel=3, stride=3): stride-3 sublane reads from scratch ---
    # TODO(synk): evaluate a value-side (lpt,3,Cout) reshape/strided variant to
    # drop the scratch round trip if its lowering is profitable.
    p0 = v_scr[pl.ds(0, lpt, stride=3), :]
    p1 = v_scr[pl.ds(1, lpt, stride=3), :]
    p2 = v_scr[pl.ds(2, lpt, stride=3), :]
    pooled = jnp.maximum(jnp.maximum(p0, p1), p2)        # (lpt, Cout)
    pooled_ref[0] = pooled

    # --- running sum of pooled frames (AdaptiveAvgPool1d numerator) ---
    @pl.when(t == 0)
    def _init():
        sum_ref[...] = jnp.zeros_like(sum_ref)
    sum_ref[0] += jnp.sum(pooled, axis=0, keepdims=True)


def _res_apply_kernel(pooled_ref, sum_ref, wfc_ref, bfc_ref, out_ref, *, inv_lp):
    """Second pass: AdaptiveAvgPool1d(1) -> Linear -> Sigmoid -> x*y + y."""
    avg = sum_ref[0] * inv_lp                            # (1, Cout)
    y = jax.nn.sigmoid(
        jnp.dot(avg.astype(jnp.bfloat16), wfc_ref[...],
                preferred_element_type=jnp.float32) + bfc_ref[...])
    xp = pooled_ref[0]                                   # (lpt, Cout)
    out_ref[0] = xp * y + y


def _fold_bn(gamma, beta, mean, var):
    scale = gamma / jnp.sqrt(var + BN_EPS)
    shift = beta - mean * scale
    return scale, shift


@functools.partial(jax.jit, static_argnames=("lp_tile",))
def resblock_forward(x_ncl, p, lp_tile=None):
    """ResBlock forward: (B, Cin, L) f32 -> (B, Cout, L // 3) f32."""
    B, Cin, L = x_ncl.shape
    Cout = p["w1"].shape[0]
    assert L % 3 == 0  # TODO(synk): handle MaxPool1d(3) remainder truncation.
    LP = L // 3
    if lp_tile is None:
        lp_tile = min(LP, 512)  # TODO(synk): tune per generation (larger on
        #                       v5e/v6e + vmem_limit_bytes, smaller on v7x 64MiB).
    assert LP % lp_tile == 0, "pooled length must be divisible by lp_tile"
    LPT = lp_tile
    nT = LP // LPT
    LT = 3 * LPT

    # --- glue: fold BN, fold conv taps into one contraction dim, bf16 weights ---
    scale1, shift1 = _fold_bn(p["gamma1"], p["beta1"], p["mean1"], p["var1"])
    scale2, shift2 = _fold_bn(p["gamma2"], p["beta2"], p["mean2"], p["var2"])
    scale1 = scale1.reshape(1, Cin)
    shift1 = shift1.reshape(1, Cin)
    scale2 = scale2.reshape(1, Cout)
    shift2 = shift2.reshape(1, Cout)
    # (Cout, Cin, 3) -> (3*Cin, Cout); row index = tap*Cin + cin, tap 0 <-> x[l-1]
    w1cat = jnp.transpose(p["w1"], (2, 1, 0)).reshape(3 * Cin, Cout).astype(jnp.bfloat16)
    w2cat = jnp.transpose(p["w2"], (2, 1, 0)).reshape(3 * Cout, Cout).astype(jnp.bfloat16)
    use_ds = p.get("wd") is not None
    wdt = (jnp.transpose(p["wd"][:, :, 0], (1, 0)).astype(jnp.bfloat16)
           if use_ds else jnp.zeros((Cin, Cout), jnp.bfloat16))
    wfct = jnp.transpose(p["wfc"], (1, 0)).astype(jnp.bfloat16)
    b2 = p["b2"].reshape(1, Cout)
    bfc = p["bfc"].reshape(1, Cout)

    # --- time-tiled input with a 2-row halo per tile (k=3 conv applied twice) ---
    # TODO(synk): replace this wrapper-side overlap materialization (and the
    # NCL->NLC transpose) with element-indexed blocks / manual halo DMA; an
    # NCL-internal (channels-on-sublane, time-on-lane) layout is blocked on the
    # stride-3 max pool needing sublane (not lane) strides.
    x_blc = jnp.transpose(x_ncl, (0, 2, 1))                  # (B, L, Cin)
    x_pad = jnp.pad(x_blc, ((0, 0), (2, 2), (0, 0)))         # (B, L+4, Cin)
    xov = jnp.stack([x_pad[:, ti * LT: ti * LT + LT + 4, :] for ti in range(nT)],
                    axis=1)                                  # (B, nT, LT+4, Cin)

    rep = lambda shape: pl.BlockSpec(shape, lambda b, t: (0,) * len(shape))

    # --- pass 1: conv stack + residual + max pool; emits pooled frames and the
    #     per-batch pooled sum (accumulator output over the time-tile axis). ---
    # TODO(synk): pipeline_mode=pl.Buffered(1) on the replicated weight blocks
    # would reclaim their second VMEM buffer (v7x).
    pooled, sums = pl.pallas_call(
        functools.partial(_res_main_kernel, lt=LT, lpt=LPT, l_total=L,
                          use_downsample=use_ds),
        out_shape=(jax.ShapeDtypeStruct((B, LP, Cout), jnp.float32),
                   jax.ShapeDtypeStruct((B, 1, Cout), jnp.float32)),
        grid=(B, nT),
        in_specs=[
            pl.BlockSpec((1, 1, LT + 4, Cin), lambda b, t: (b, t, 0, 0)),  # x (haloed)
            rep((1, Cin)), rep((1, Cin)),                                  # bn1 scale/shift
            rep((3 * Cin, Cout)),                                          # conv1 weight
            rep((1, Cout)), rep((1, Cout)),                                # bn2 scale/shift
            rep((3 * Cout, Cout)),                                         # conv2 weight
            rep((1, Cout)),                                                # conv2 bias
            rep((Cin, Cout)),                                              # 1x1 downsample
        ],
        out_specs=(pl.BlockSpec((1, LPT, Cout), lambda b, t: (b, t, 0)),
                   pl.BlockSpec((1, 1, Cout), lambda b, t: (b, 0, 0))),
        scratch_shapes=[pltpu.VMEM((LT, Cout), jnp.float32)],
        compiler_params=pltpu.CompilerParams(
            dimension_semantics=("parallel", "arbitrary")),
    )(xov, scale1, shift1, w1cat, scale2, shift2, w2cat, b2, wdt)

    # --- pass 2: avg -> Linear -> Sigmoid -> pooled * y + y ---
    out_blc = pl.pallas_call(
        functools.partial(_res_apply_kernel, inv_lp=1.0 / LP),
        out_shape=jax.ShapeDtypeStruct((B, LP, Cout), jnp.float32),
        grid=(B, nT),
        in_specs=[
            pl.BlockSpec((1, LPT, Cout), lambda b, t: (b, t, 0)),
            pl.BlockSpec((1, 1, Cout), lambda b, t: (b, 0, 0)),
            rep((Cout, Cout)),                                             # fc weight
            rep((1, Cout)),                                                # fc bias
        ],
        out_specs=pl.BlockSpec((1, LPT, Cout), lambda b, t: (b, t, 0)),
        compiler_params=pltpu.CompilerParams(
            dimension_semantics=("parallel", "parallel")),
    )(pooled, sums, wfct, bfc)

    # TODO(synk): narrow early blocks (Cout=20) store lane-masked (LPT, Cout)
    # tiles; later RawNet2 blocks (Cout=128) are already lane-dense.  Making the
    # narrow case lane-dense needs Cout padding or an in-kernel transpose to
    # (Cout, LPT).
    return jnp.transpose(out_blc, (0, 2, 1))                 # (B, Cout, LP)


def resblock_reference(x, p, matmul_dtype=jnp.float32):
    """Pure-JAX/XLA reference (NCL), matching the PyTorch forward.

    matmul_dtype=bfloat16 mirrors the kernel's bf16 MXU contractions (tight
    indexing/halo/pooling check); float32 uses HIGHEST precision as a golden.
    """
    scale1, shift1 = _fold_bn(p["gamma1"], p["beta1"], p["mean1"], p["var1"])
    scale2, shift2 = _fold_bn(p["gamma2"], p["beta2"], p["mean2"], p["var2"])

    def bn(z, scale, shift):
        return z * scale[None, :, None] + shift[None, :, None]

    def lrelu(z):
        return jnp.where(z > 0, z, LRELU_SLOPE * z)

    prec = jax.lax.Precision.HIGHEST if matmul_dtype == jnp.float32 else None

    def conv(z, w, pad):
        return jax.lax.conv_general_dilated(
            z.astype(matmul_dtype), w.astype(matmul_dtype),
            window_strides=(1,), padding=[(pad, pad)],
            dimension_numbers=("NCH", "OIH", "NCH"),
            preferred_element_type=jnp.float32, precision=prec)

    h = lrelu(bn(x, scale1, shift1))
    h = conv(h, p["w1"], 1)
    h = lrelu(bn(h, scale2, shift2))
    h = conv(h, p["w2"], 1) + p["b2"][None, :, None]
    res = conv(x, p["wd"], 0) if p.get("wd") is not None else x
    s = h + res

    B, C, L = s.shape
    Lp = L // 3
    pooled = s[:, :, : Lp * 3].reshape(B, C, Lp, 3).max(axis=-1)
    avg = pooled.mean(axis=-1)
    y = jax.nn.sigmoid(
        jnp.dot(avg.astype(matmul_dtype), p["wfc"].T.astype(matmul_dtype),
                preferred_element_type=jnp.float32) + p["bfc"])[:, :, None]
    return pooled * y + y


def make_params(key, cin, cout):
    ks = jax.random.split(key, 14)
    n = lambda k, shape, s=0.3: s * jax.random.normal(k, shape, jnp.float32)
    return {
        "gamma1": 1.0 + n(ks[0], (cin,), 0.1),
        "beta1": n(ks[1], (cin,), 0.1),
        "mean1": n(ks[2], (cin,), 0.1),
        "var1": jax.random.uniform(ks[3], (cin,), jnp.float32, 0.5, 1.5),
        "w1": n(ks[4], (cout, cin, 3)),
        "gamma2": 1.0 + n(ks[5], (cout,), 0.1),
        "beta2": n(ks[6], (cout,), 0.1),
        "mean2": n(ks[7], (cout,), 0.1),
        "var2": jax.random.uniform(ks[8], (cout,), jnp.float32, 0.5, 1.5),
        "w2": n(ks[9], (cout, cout, 3)),
        "b2": n(ks[10], (cout,), 0.1),
        # ResBlock: 1x1 downsample only exists when in/out channels differ.
        "wd": n(ks[11], (cout, cin, 1)) if cin != cout else None,
        "wfc": n(ks[12], (cout, cout)),
        "bfc": n(ks[13], (cout,), 0.1),
    }


if __name__ == "__main__":
    key = jax.random.PRNGKey(0)
    k1, k2, k3, k4 = jax.random.split(key, 4)

    # Config A: Cin != Cout (1x1 downsample path), 2 time-tiles per batch row.
    B, CIN, COUT, L = 2, 8, 16, 48
    x = jax.random.normal(k1, (B, CIN, L), jnp.float32)
    params = make_params(k2, CIN, COUT)
    out = jax.block_until_ready(resblock_forward(x, params, lp_tile=8))
    assert out.shape == (B, COUT, L // 3)
    ref_m = resblock_reference(x, params, matmul_dtype=jnp.bfloat16)
    ref_g = resblock_reference(x, params, matmul_dtype=jnp.float32)
    assert jnp.allclose(out, ref_m, rtol=2e-3, atol=2e-3), (
        f"bf16-matched max abs diff {jnp.max(jnp.abs(out - ref_m))}")
    assert jnp.allclose(out, ref_g, rtol=5e-2, atol=5e-2), (
        f"f32-golden max abs diff {jnp.max(jnp.abs(out - ref_g))}")

    # Config B: Cin == Cout (identity residual, no downsample), single time-tile.
    B2, C2, L2 = 2, 16, 48
    x2 = jax.random.normal(k3, (B2, C2, L2), jnp.float32)
    params2 = make_params(k4, C2, C2)
    out2 = jax.block_until_ready(resblock_forward(x2, params2, lp_tile=16))
    assert out2.shape == (B2, C2, L2 // 3)
    ref2 = resblock_reference(x2, params2, matmul_dtype=jnp.bfloat16)
    assert jnp.allclose(out2, ref2, rtol=2e-3, atol=2e-3), (
        f"identity-residual max abs diff {jnp.max(jnp.abs(out2 - ref2))}")

    print("KERNEL_OK")
</pallas_src>

<mosaic_0001>
module attributes {stable_mosaic.version = 11 : i64} {
  func.func @_res_main_kernel(%arg0: i32, %arg1: i32, %arg2: memref<1x1x28x8xf32, #tpu.memory_space<vmem>>, %arg3: memref<1x8xf32, #tpu.memory_space<vmem>>, %arg4: memref<1x8xf32, #tpu.memory_space<vmem>>, %arg5: memref<24x16xbf16, #tpu.memory_space<vmem>>, %arg6: memref<1x16xf32, #tpu.memory_space<vmem>>, %arg7: memref<1x16xf32, #tpu.memory_space<vmem>>, %arg8: memref<48x16xbf16, #tpu.memory_space<vmem>>, %arg9: memref<1x16xf32, #tpu.memory_space<vmem>>, %arg10: memref<8x16xbf16, #tpu.memory_space<vmem>>, %arg11: memref<1x8x16xf32, #tpu.memory_space<vmem>>, %arg12: memref<1x1x16xf32, #tpu.memory_space<vmem>>, %arg13: memref<24x16xf32, #tpu.memory_space<vmem>>) attributes {dimension_semantics = [#tpu.dimension_semantics<parallel>, #tpu.dimension_semantics<arbitrary>], iteration_bounds = array<i64: 2, 2>, scalar_prefetch = 0 : i64, scratch_operands = 1 : i64, tpu.core_type = #tpu.core_type<tc>, window_params = [{transform_indices = @transform_0, window_bounds = array<i64: 1, 1, 28, 8>}, {pipeline_mode = #tpu.pipeline_mode<synchronous>, transform_indices = @transform_1, window_bounds = array<i64: 1, 8>}, {pipeline_mode = #tpu.pipeline_mode<synchronous>, transform_indices = @transform_2, window_bounds = array<i64: 1, 8>}, {pipeline_mode = #tpu.pipeline_mode<synchronous>, transform_indices = @transform_3, window_bounds = array<i64: 24, 16>}, {pipeline_mode = #tpu.pipeline_mode<synchronous>, transform_indices = @transform_4, window_bounds = array<i64: 1, 16>}, {pipeline_mode = #tpu.pipeline_mode<synchronous>, transform_indices = @transform_5, window_bounds = array<i64: 1, 16>}, {pipeline_mode = #tpu.pipeline_mode<synchronous>, transform_indices = @transform_6, window_bounds = array<i64: 48, 16>}, {pipeline_mode = #tpu.pipeline_mode<synchronous>, transform_indices = @transform_7, window_bounds = array<i64: 1, 16>}, {pipeline_mode = #tpu.pipeline_mode<synchronous>, transform_indices = @transform_8, window_bounds = array<i64: 8, 16>}, {transform_indices = @transform_9, window_bounds = array<i64: 1, 8, 16>}, {transform_indices = @transform_10, window_bounds = array<i64: 1, 1, 16>}]} {
    %c24_i32 = arith.constant 24 : i32
    %0 = arith.muli %arg1, %c24_i32 : i32
    %c0 = arith.constant 0 : index
    %c0_0 = arith.constant 0 : index
    %c0_1 = arith.constant 0 : index
    %c0_2 = arith.constant 0 : index
    %1 = vector.load %arg2[%c0, %c0_0, %c0_1, %c0_2] : memref<1x1x28x8xf32, #tpu.memory_space<vmem>>, vector<1x1x28x8xf32>
    %2 = vector.shape_cast %1 : vector<1x1x28x8xf32> to vector<28x8xf32>
    %c0_3 = arith.constant 0 : index
    %c0_4 = arith.constant 0 : index
    %3 = vector.load %arg3[%c0_3, %c0_4] : memref<1x8xf32, #tpu.memory_space<vmem>>, vector<1x8xf32>
    %4 = vector.broadcast %3 : vector<1x8xf32> to vector<28x8xf32>
    %5 = arith.mulf %2, %4 : vector<28x8xf32>
    %c0_5 = arith.constant 0 : index
    %c0_6 = arith.constant 0 : index
    %6 = vector.load %arg4[%c0_5, %c0_6] : memref<1x8xf32, #tpu.memory_space<vmem>>, vector<1x8xf32>
    %7 = vector.broadcast %6 : vector<1x8xf32> to vector<28x8xf32>
    %8 = arith.addf %5, %7 : vector<28x8xf32>
    %cst = arith.constant 0.000000e+00 : f32
    %9 = vector.broadcast %cst : f32 to vector<28x8xf32>
    %10 = arith.cmpf ogt, %8, %9 : vector<28x8xf32>
    %cst_7 = arith.constant 0.00999999977 : f32
    %11 = vector.broadcast %cst_7 : f32 to vector<28x8xf32>
    %12 = arith.mulf %11, %8 : vector<28x8xf32>
    %13 = arith.select %10, %8, %12 : vector<28x8xi1>, vector<28x8xf32>
    %14 = tpu.iota {dimensions = array<i32: 0>} : vector<28x1xi32>
    %c2_i32 = arith.constant 2 : i32
    %15 = arith.subi %0, %c2_i32 : i32
    %16 = vector.broadcast %15 : i32 to vector<28x1xi32>
    %17 = arith.addi %14, %16 : vector<28x1xi32>
    %c0_i32 = arith.constant 0 : i32
    %18 = vector.broadcast %c0_i32 : i32 to vector<28x1xi32>
    %19 = arith.cmpi sge, %17, %18 : vector<28x1xi32>
    %c48_i32 = arith.constant 48 : i32
    %20 = vector.broadcast %c48_i32 : i32 to vector<28x1xi32>
    %21 = arith.cmpi slt, %17, %20 : vector<28x1xi32>
    %22 = arith.andi %19, %21 : vector<28x1xi1>
    %cst_8 = arith.constant 0.000000e+00 : f32
    %23 = vector.shape_cast %22 : vector<28x1xi1> to vector<28x1xi1>
    %24 = vector.broadcast %23 : vector<28x1xi1> to vector<28x8xi1>
    %25 = vector.broadcast %cst_8 : f32 to vector<28x8xf32>
    %26 = arith.select %24, %13, %25 : vector<28x8xi1>, vector<28x8xf32>
    %27 = vector.extract_strided_slice %26 {offsets = [0, 0], sizes = [26, 8], strides = [1, 1]} : vector<28x8xf32> to vector<26x8xf32>
    %28 = vector.extract_strided_slice %26 {offsets = [1, 0], sizes = [26, 8], strides = [1, 1]} : vector<28x8xf32> to vector<26x8xf32>
    %29 = vector.extract_strided_slice %26 {offsets = [2, 0], sizes = [26, 8], strides = [1, 1]} : vector<28x8xf32> to vector<26x8xf32>
    %30 = tpu.concatenate %27, %28, %29 in 1 : vector<26x8xf32>, vector<26x8xf32>, vector<26x8xf32> -> vector<26x24xf32>
    %31 = arith.truncf %30 : vector<26x24xf32> to vector<26x24xbf16>
    %c0_9 = arith.constant 0 : index
    %c0_10 = arith.constant 0 : index
    %32 = vector.load %arg5[%c0_9, %c0_10] : memref<24x16xbf16, #tpu.memory_space<vmem>>, vector<24x16xbf16>
    %cst_11 = arith.constant dense<0.000000e+00> : vector<26x16xf32>
    %33 = tpu.matmul %31, %32, %cst_11 {dimension_numbers = #tpu.dot_dimension_numbers<[1], [0], [0], [1], [0, 0, 1, 1], [], []>} : vector<26x24xbf16>, vector<24x16xbf16>, vector<26x16xf32> -> vector<26x16xf32>
    %c0_12 = arith.constant 0 : index
    %c0_13 = arith.constant 0 : index
    %34 = vector.load %arg6[%c0_12, %c0_13] : memref<1x16xf32, #tpu.memory_space<vmem>>, vector<1x16xf32>
    %35 = vector.broadcast %34 : vector<1x16xf32> to vector<26x16xf32>
    %36 = arith.mulf %33, %35 : vector<26x16xf32>
    %c0_14 = arith.constant 0 : index
    %c0_15 = arith.constant 0 : index
    %37 = vector.load %arg7[%c0_14, %c0_15] : memref<1x16xf32, #tpu.memory_space<vmem>>, vector<1x16xf32>
    %38 = vector.broadcast %37 : vector<1x16xf32> to vector<26x16xf32>
    %39 = arith.addf %36, %38 : vector<26x16xf32>
    %cst_16 = arith.constant 0.000000e+00 : f32
    %40 = vector.broadcast %cst_16 : f32 to vector<26x16xf32>
    %41 = arith.cmpf ogt, %39, %40 : vector<26x16xf32>
    %cst_17 = arith.constant 0.00999999977 : f32
    %42 = vector.broadcast %cst_17 : f32 to vector<26x16xf32>
    %43 = arith.mulf %42, %39 : vector<26x16xf32>
    %44 = arith.select %41, %39, %43 : vector<26x16xi1>, vector<26x16xf32>
    %45 = tpu.iota {dimensions = array<i32: 0>} : vector<26x1xi32>
    %c1_i32 = arith.constant 1 : i32
    %46 = arith.subi %0, %c1_i32 : i32
    %47 = vector.broadcast %46 : i32 to vector<26x1xi32>
    %48 = arith.addi %45, %47 : vector<26x1xi32>
    %c0_i32_18 = arith.constant 0 : i32
    %49 = vector.broadcast %c0_i32_18 : i32 to vector<26x1xi32>
    %50 = arith.cmpi sge, %48, %49 : vector<26x1xi32>
    %c48_i32_19 = arith.constant 48 : i32
    %51 = vector.broadcast %c48_i32_19 : i32 to vector<26x1xi32>
    %52 = arith.cmpi slt, %48, %51 : vector<26x1xi32>
    %53 = arith.andi %50, %52 : vector<26x1xi1>
    %cst_20 = arith.constant 0.000000e+00 : f32
    %54 = vector.shape_cast %53 : vector<26x1xi1> to vector<26x1xi1>
    %55 = vector.broadcast %54 : vector<26x1xi1> to vector<26x16xi1>
    %56 = vector.broadcast %cst_20 : f32 to vector<26x16xf32>
    %57 = arith.select %55, %44, %56 : vector<26x16xi1>, vector<26x16xf32>
    %58 = vector.extract_strided_slice %57 {offsets = [0, 0], sizes = [24, 16], strides = [1, 1]} : vector<26x16xf32> to vector<24x16xf32>
    %59 = vector.extract_strided_slice %57 {offsets = [1, 0], sizes = [24, 16], strides = [1, 1]} : vector<26x16xf32> to vector<24x16xf32>
    %60 = vector.extract_strided_slice %57 {offsets = [2, 0], sizes = [24, 16], strides = [1, 1]} : vector<26x16xf32> to vector<24x16xf32>
    %61 = tpu.concatenate %58, %59, %60 in 1 : vector<24x16xf32>, vector<24x16xf32>, vector<24x16xf32> -> vector<24x48xf32>
    %62 = arith.truncf %61 : vector<24x48xf32> to vector<24x48xbf16>
    %c0_21 = arith.constant 0 : index
    %c0_22 = arith.constant 0 : index
    %63 = vector.load %arg8[%c0_21, %c0_22] : memref<48x16xbf16, #tpu.memory_space<vmem>>, vector<48x16xbf16>
    %cst_23 = arith.constant dense<0.000000e+00> : vector<24x16xf32>
    %64 = tpu.matmul %62, %63, %cst_23 {dimension_numbers = #tpu.dot_dimension_numbers<[1], [0], [0], [1], [0, 0, 1, 1], [], []>} : vector<24x48xbf16>, vector<48x16xbf16>, vector<24x16xf32> -> vector<24x16xf32>
    %c0_24 = arith.constant 0 : index
    %c0_25 = arith.constant 0 : index
    %65 = vector.load %arg9[%c0_24, %c0_25] : memref<1x16xf32, #tpu.memory_space<vmem>>, vector<1x16xf32>
    %66 = vector.broadcast %65 : vector<1x16xf32> to vector<24x16xf32>
    %67 = arith.addf %64, %66 : vector<24x16xf32>
    %68 = vector.extract_strided_slice %2 {offsets = [2, 0], sizes = [24, 8], strides = [1, 1]} : vector<28x8xf32> to vector<24x8xf32>
    %69 = arith.truncf %68 : vector<24x8xf32> to vector<24x8xbf16>
    %c0_26 = arith.constant 0 : index
    %c0_27 = arith.constant 0 : index
    %70 = vector.load %arg10[%c0_26, %c0_27] : memref<8x16xbf16, #tpu.memory_space<vmem>>, vector<8x16xbf16>
    %cst_28 = arith.constant dense<0.000000e+00> : vector<24x16xf32>
    %71 = tpu.matmul %69, %70, %cst_28 {dimension_numbers = #tpu.dot_dimension_numbers<[1], [0], [0], [1], [0, 0, 1, 1], [], []>} : vector<24x8xbf16>, vector<8x16xbf16>, vector<24x16xf32> -> vector<24x16xf32>
    %72 = arith.addf %67, %71 : vector<24x16xf32>
    %c0_29 = arith.constant 0 : index
    %c0_30 = arith.constant 0 : index
    %73 = vector.load %arg13[%c0_29, %c0_30] : memref<24x16xf32, #tpu.memory_space<vmem>>, vector<24x16xf32>
    tpu.vector_store %arg13[%c0_29, %c0_30], %72 {strides = array<i32>} : memref<24x16xf32, #tpu.memory_space<vmem>>, vector<24x16xf32>,
    %c0_31 = arith.constant 0 : index
    %c0_32 = arith.constant 0 : index
    %74 = tpu.strided_load %arg13[%c0_31, %c0_32] {strides = array<i32: 3, 1>} : memref<24x16xf32, #tpu.memory_space<vmem>>, vector<8x16xf32>
    %c1 = arith.constant 1 : index
    %c0_33 = arith.constant 0 : index
    %75 = tpu.strided_load %arg13[%c1, %c0_33] {strides = array<i32: 3, 1>} : memref<24x16xf32, #tpu.memory_space<vmem>>, vector<8x16xf32>
    %c2 = arith.constant 2 : index
    %c0_34 = arith.constant 0 : index
    %76 = tpu.strided_load %arg13[%c2, %c0_34] {strides = array<i32: 3, 1>} : memref<24x16xf32, #tpu.memory_space<vmem>>, vector<8x16xf32>
    %77 = arith.maximumf %74, %75 : vector<8x16xf32>
    %78 = arith.maximumf %77, %76 : vector<8x16xf32>
    %c0_35 = arith.constant 0 : index
    %c0_36 = arith.constant 0 : index
    %c0_37 = arith.constant 0 : index
    %79 = vector.load %arg11[%c0_35, %c0_36, %c0_37] : memref<1x8x16xf32, #tpu.memory_space<vmem>>, vector<1x8x16xf32>
    %80 = vector.shape_cast %79 : vector<1x8x16xf32> to vector<8x16xf32>
    %81 = vector.shape_cast %78 : vector<8x16xf32> to vector<1x8x16xf32>
    tpu.vector_store %arg11[%c0_35, %c0_36, %c0_37], %81 {strides = array<i32>} : memref<1x8x16xf32, #tpu.memory_space<vmem>>, vector<1x8x16xf32>,
    %c0_i32_38 = arith.constant 0 : i32
    %82 = arith.cmpi eq, %arg1, %c0_i32_38 : i32
    %83 = arith.extui %82 : i1 to i32
    %c0_i32_39 = arith.constant 0 : i32
    %84 = arith.cmpi ne, %83, %c0_i32_39 : i32
    scf.if %84 {
      %cst_47 = arith.constant 0.000000e+00 : f32
      %93 = vector.broadcast %cst_47 : f32 to vector<1x1x16xf32>
      %c0_48 = arith.constant 0 : index
      %c0_49 = arith.constant 0 : index
      %c0_50 = arith.constant 0 : index
      %94 = vector.load %arg12[%c0_48, %c0_49, %c0_50] : memref<1x1x16xf32, #tpu.memory_space<vmem>>, vector<1x1x16xf32>
      tpu.vector_store %arg12[%c0_48, %c0_49, %c0_50], %93 {strides = array<i32>} : memref<1x1x16xf32, #tpu.memory_space<vmem>>, vector<1x1x16xf32>,
    } else {
    }
    %c0_40 = arith.constant 0 : index
    %c0_41 = arith.constant 0 : index
    %c0_42 = arith.constant 0 : index
    %85 = vector.load %arg12[%c0_40, %c0_41, %c0_42] : memref<1x1x16xf32, #tpu.memory_space<vmem>>, vector<1x1x16xf32>
    %86 = vector.shape_cast %85 : vector<1x1x16xf32> to vector<1x16xf32>
    %cst_43 = arith.constant dense<0.000000e+00> : vector<16xf32>
    %87 = vector.multi_reduction <add>, %78, %cst_43 [0] : vector<8x16xf32> to vector<16xf32>
    %88 = vector.shape_cast %87 : vector<16xf32> to vector<1x16xf32>
    %89 = arith.addf %86, %88 : vector<1x16xf32>
    %c0_44 = arith.constant 0 : index
    %c0_45 = arith.constant 0 : index
    %c0_46 = arith.constant 0 : index
    %90 = vector.load %arg12[%c0_44, %c0_45, %c0_46] : memref<1x1x16xf32, #tpu.memory_space<vmem>>, vector<1x1x16xf32>
    %91 = vector.shape_cast %90 : vector<1x1x16xf32> to vector<1x16xf32>
    %92 = vector.shape_cast %89 : vector<1x16xf32> to vector<1x1x16xf32>
    tpu.vector_store %arg12[%c0_44, %c0_45, %c0_46], %92 {strides = array<i32>} : memref<1x1x16xf32, #tpu.memory_space<vmem>>, vector<1x1x16xf32>,
    return
  }
  func.func @transform_0(%arg0: i32, %arg1: i32) -> (i32, i32, i32, i32) {
    %c0_i32 = arith.constant 0 : i32
    %c0_i32_0 = arith.constant 0 : i32
    %c0_i32_1 = arith.constant 0 : i32
    return %arg0, %arg1, %c0_i32, %c0_i32_0 : i32, i32, i32, i32
  }
  func.func @transform_1(%arg0: i32, %arg1: i32) -> (i32, i32) {
    %c0_i32 = arith.constant 0 : i32
    %c0_i32_0 = arith.constant 0 : i32
    %c0_i32_1 = arith.constant 0 : i32
    return %c0_i32, %c0_i32_0 : i32, i32
  }
  func.func @transform_2(%arg0: i32, %arg1: i32) -> (i32, i32) {
    %c0_i32 = arith.constant 0 : i32
    %c0_i32_0 = arith.constant 0 : i32
    %c0_i32_1 = arith.constant 0 : i32
    return %c0_i32, %c0_i32_0 : i32, i32
  }
  func.func @transform_3(%arg0: i32, %arg1: i32) -> (i32, i32) {
    %c0_i32 = arith.constant 0 : i32
    %c0_i32_0 = arith.constant 0 : i32
    %c0_i32_1 = arith.constant 0 : i32
    return %c0_i32, %c0_i32_0 : i32, i32
  }
  func.func @transform_4(%arg0: i32, %arg1: i32) -> (i32, i32) {
    %c0_i32 = arith.constant 0 : i32
    %c0_i32_0 = arith.constant 0 : i32
    %c0_i32_1 = arith.constant 0 : i32
    return %c0_i32, %c0_i32_0 : i32, i32
  }
  func.func @transform_5(%arg0: i32, %arg1: i32) -> (i32, i32) {
    %c0_i32 = arith.constant 0 : i32
    %c0_i32_0 = arith.constant 0 : i32
    %c0_i32_1 = arith.constant 0 : i32
    return %c0_i32, %c0_i32_0 : i32, i32
  }
  func.func @transform_6(%arg0: i32, %arg1: i32) -> (i32, i32) {
    %c0_i32 = arith.constant 0 : i32
    %c0_i32_0 = arith.constant 0 : i32
    %c0_i32_1 = arith.constant 0 : i32
    return %c0_i32, %c0_i32_0 : i32, i32
  }
  func.func @transform_7(%arg0: i32, %arg1: i32) -> (i32, i32) {
    %c0_i32 = arith.constant 0 : i32
    %c0_i32_0 = arith.constant 0 : i32
    %c0_i32_1 = arith.constant 0 : i32
    return %c0_i32, %c0_i32_0 : i32, i32
  }
  func.func @transform_8(%arg0: i32, %arg1: i32) -> (i32, i32) {
    %c0_i32 = arith.constant 0 : i32
    %c0_i32_0 = arith.constant 0 : i32
    %c0_i32_1 = arith.constant 0 : i32
    return %c0_i32, %c0_i32_0 : i32, i32
  }
  func.func @transform_9(%arg0: i32, %arg1: i32) -> (i32, i32, i32) {
    %c0_i32 = arith.constant 0 : i32
    %c0_i32_0 = arith.constant 0 : i32
    return %arg0, %arg1, %c0_i32 : i32, i32, i32
  }
  func.func @transform_10(%arg0: i32, %arg1: i32) -> (i32, i32, i32) {
    %c0_i32 = arith.constant 0 : i32
    %c0_i32_0 = arith.constant 0 : i32
    %c0_i32_1 = arith.constant 0 : i32
    return %arg0, %c0_i32, %c0_i32_0 : i32, i32, i32
  }
}

module attributes {stable_mosaic.version = 11 : i64} {
  func.func @_res_apply_kernel(%arg0: i32, %arg1: i32, %arg2: memref<1x8x16xf32, #tpu.memory_space<vmem>>, %arg3: memref<1x1x16xf32, #tpu.memory_space<vmem>>, %arg4: memref<16x16xbf16, #tpu.memory_space<vmem>>, %arg5: memref<1x16xf32, #tpu.memory_space<vmem>>, %arg6: memref<1x8x16xf32, #tpu.memory_space<vmem>>) attributes {dimension_semantics = [#tpu.dimension_semantics<parallel>, #tpu.dimension_semantics<parallel>], iteration_bounds = array<i64: 2, 2>, scalar_prefetch = 0 : i64, scratch_operands = 0 : i64, tpu.core_type = #tpu.core_type<tc>, window_params = [{transform_indices = @transform_0, window_bounds = array<i64: 1, 8, 16>}, {transform_indices = @transform_1, window_bounds = array<i64: 1, 1, 16>}, {pipeline_mode = #tpu.pipeline_mode<synchronous>, transform_indices = @transform_2, window_bounds = array<i64: 16, 16>}, {pipeline_mode = #tpu.pipeline_mode<synchronous>, transform_indices = @transform_3, window_bounds = array<i64: 1, 16>}, {transform_indices = @transform_4, window_bounds = array<i64: 1, 8, 16>}]} {
    %c0 = arith.constant 0 : index
    %c0_0 = arith.constant 0 : index
    %c0_1 = arith.constant 0 : index
    %0 = vector.load %arg3[%c0, %c0_0, %c0_1] : memref<1x1x16xf32, #tpu.memory_space<vmem>>, vector<1x1x16xf32>
    %1 = vector.shape_cast %0 : vector<1x1x16xf32> to vector<1x16xf32>
    %cst = arith.constant 6.250000e-02 : f32
    %2 = vector.broadcast %cst : f32 to vector<1x16xf32>
    %3 = arith.mulf %1, %2 : vector<1x16xf32>
    %4 = arith.truncf %3 : vector<1x16xf32> to vector<1x16xbf16>
    %c0_2 = arith.constant 0 : index
    %c0_3 = arith.constant 0 : index
    %5 = vector.load %arg4[%c0_2, %c0_3] : memref<16x16xbf16, #tpu.memory_space<vmem>>, vector<16x16xbf16>
    %cst_4 = arith.constant dense<0.000000e+00> : vector<1x16xf32>
    %6 = tpu.matmul %4, %5, %cst_4 {dimension_numbers = #tpu.dot_dimension_numbers<[1], [0], [0], [1], [0, 0, 1, 1], [], []>} : vector<1x16xbf16>, vector<16x16xbf16>, vector<1x16xf32> -> vector<1x16xf32>
    %c0_5 = arith.constant 0 : index
    %c0_6 = arith.constant 0 : index
    %7 = vector.load %arg5[%c0_5, %c0_6] : memref<1x16xf32, #tpu.memory_space<vmem>>, vector<1x16xf32>
    %8 = arith.addf %6, %7 : vector<1x16xf32>
    %9 = arith.negf %8 : vector<1x16xf32>
    %10 = math.exp %9 : vector<1x16xf32>
    %cst_7 = arith.constant 1.000000e+00 : f32
    %11 = vector.broadcast %cst_7 : f32 to vector<1x16xf32>
    %12 = arith.addf %11, %10 : vector<1x16xf32>
    %13 = arith.divf %11, %12 : vector<1x16xf32>
    %c0_8 = arith.constant 0 : index
    %c0_9 = arith.constant 0 : index
    %c0_10 = arith.constant 0 : index
    %14 = vector.load %arg2[%c0_8, %c0_9, %c0_10] : memref<1x8x16xf32, #tpu.memory_space<vmem>>, vector<1x8x16xf32>
    %15 = vector.shape_cast %14 : vector<1x8x16xf32> to vector<8x16xf32>
    %16 = vector.broadcast %13 : vector<1x16xf32> to vector<8x16xf32>
    %17 = arith.mulf %15, %16 : vector<8x16xf32>
    %18 = vector.broadcast %13 : vector<1x16xf32> to vector<8x16xf32>
    %19 = arith.addf %17, %18 : vector<8x16xf32>
    %c0_11 = arith.constant 0 : index
    %c0_12 = arith.constant 0 : index
    %c0_13 = arith.constant 0 : index
    %20 = vector.load %arg6[%c0_11, %c0_12, %c0_13] : memref<1x8x16xf32, #tpu.memory_space<vmem>>, vector<1x8x16xf32>
    %21 = vector.shape_cast %20 : vector<1x8x16xf32> to vector<8x16xf32>
    %22 = vector.shape_cast %19 : vector<8x16xf32> to vector<1x8x16xf32>
    tpu.vector_store %arg6[%c0_11, %c0_12, %c0_13], %22 {strides = array<i32>} : memref<1x8x16xf32, #tpu.memory_space<vmem>>, vector<1x8x16xf32>,
    return
  }
  func.func @transform_0(%arg0: i32, %arg1: i32) -> (i32, i32, i32) {
    %c0_i32 = arith.constant 0 : i32
    %c0_i32_0 = arith.constant 0 : i32
    return %arg0, %arg1, %c0_i32 : i32, i32, i32
  }
  func.func @transform_1(%arg0: i32, %arg1: i32) -> (i32, i32, i32) {
    %c0_i32 = arith.constant 0 : i32
    %c0_i32_0 = arith.constant 0 : i32
    %c0_i32_1 = arith.constant 0 : i32
    return %arg0, %c0_i32, %c0_i32_0 : i32, i32, i32
  }
  func.func @transform_2(%arg0: i32, %arg1: i32) -> (i32, i32) {
    %c0_i32 = arith.constant 0 : i32
    %c0_i32_0 = arith.constant 0 : i32
    %c0_i32_1 = arith.constant 0 : i32
    return %c0_i32, %c0_i32_0 : i32, i32
  }
  func.func @transform_3(%arg0: i32, %arg1: i32) -> (i32, i32) {
    %c0_i32 = arith.constant 0 : i32
    %c0_i32_0 = arith.constant 0 : i32
    %c0_i32_1 = arith.constant 0 : i32
    return %c0_i32, %c0_i32_0 : i32, i32
  }
  func.func @transform_4(%arg0: i32, %arg1: i32) -> (i32, i32, i32) {
    %c0_i32 = arith.constant 0 : i32
    %c0_i32_0 = arith.constant 0 : i32
    return %arg0, %arg1, %c0_i32 : i32, i32, i32
  }
}

</mosaic_0001>

<bundles_post_ra>
// kernel: resblock_forward.3
= control target key start
LH: loop header
LB: loop body
LE: loop exit
PB: predicated region body
PF: predicated region fallthrough
CT: control target
= control target key end

     0   :  { %s545_s15 = smov 0   ;;  %s547_s16 = smov 0   ;;  %s611_s0 = inlined_call_operand.vmem [shape: f32[2,16,16], index: 0, kind: input, shape index: {}]   ;;  %s612_s1 = inlined_call_operand.vmem [shape: f32[2,1,16], index: 1, kind: input, shape index: {}]   ;;  %s613_s2 = inlined_call_operand.vmem [shape: bf16[16,16], index: 2, kind: input, shape index: {}]   ;;  %s614_s3 = inlined_call_operand.vmem [shape: f32[1,16], index: 3, kind: input, shape index: {}]   ;;  %s615_s4 = inlined_call_operand.vmem [shape: f32[2,16,16], index: 4, kind: output, shape index: {}]  }
   0x1   :  { %s549_s17 = smov 0   ;;  %s551_s18 = smov 0  }
   0x2   :  { %s553_s19 = smov 0  }
   0x3 LB: > { %s23_s20 = sadd.s32 1, %s508_s17  ;;  %s26_s21 = sadd.s32 1, %s512_s18  ;;  %s516_s19 = sphi %s553_s19, %s14_s19   ;;  %s512_s18 = sphi %s551_s18, %s619_s18   ;;  %s508_s17 = sphi %s549_s17, %s618_s17   ;;  %s504_s16 = sphi %s547_s16, %s617_s16   ;;  %s500_s15 = sphi %s545_s15, %s616_s15  }
   0x4   : > { %p24_p0 = scmp.ge.s32.totalorder %s23_s20, 2  ;;  %p413_p1 = scmp.ge.s32.totalorder %s516_s19, 1 }
   0x5   : > { %p189_p2 = scmp.lt.s32.totalorder %s516_s19, 5 }
   0x6   : > { %s621_s20 = smov (%p24_p0, %s23_s20), 0  ;;  %s623_s21 = smov (!%p24_p0, %s26_s21), %s512_s18 }
   0x7   : > { %p190_p3 = pnand %p413_p1, %p189_p2  ;;  %p28_p4 = scmp.ge.s32.totalorder %s623_s21, 2 }
   0x8   : > { %v473_v0 = vld [vmem:[%s613_s2] sm:$0xff] (!%p190_p3)   ;;  %v518_v1 = vmov (!%p190_p3), 0.0   ;;  %p224_p5 = scmp.lt.s32.totalorder (!%p190_p3), %s504_s16, 1  ;;  %vm519_vm0 = vmmov (!%p190_p3), 0   ;;  %vm256_vm1 = vcmask (!%p190_p3), 130048   ;;  %p226_p6 = scmp.lt.s32.totalorder (!%p190_p3), %s500_s15, 1  ;;  %v307_v14 = vlaneseq (!%p190_p3) }
   0x9   : > { %s625_s21 = smov (%p28_p4, %s623_s21), 0  ;;  %193 = sbr.rel (%p190_p3) target bundleno = 270 (0x10e), region = 36 }
   0xa   : > { %425 = vmatprep.subr.bf16.mxu0 (!%p190_p3), %v518_v1  ;;  %427 = vmatprep.mubr.msk.bf16.mxu0 (!%p190_p3), %vm519_vm0, %v518_v1  ;;  %v249_v5 = vld [vmem:[%s614_s3] sm:$0x1] (!%p190_p3)  ;;  %v308_v15 = vshrl.u32 (!%p190_p3), %v307_v14, 7 }
   0xb   : > { %426 = vmatpush3.bf16.msra.mxu0 (!%p190_p3), %v473_v0 }
   0xc   : > { %v309_v16 = vsub.s32 (!%p190_p3), 0, %v308_v15 }
  0x10   : > { %s627_s16 = smov (!%p224_p5, %s504_s16), 1  ;;  %s629_s15 = smov (!%p226_p6, %s500_s15), 1 }
  0x11   : > { %s234_s26 = scalar_lea.vmem %s612_s1, %s627_s16  ;;  %s414_s29 = sshll.u32 %s627_s16, 1 }
  0x12   : > { %v244_v2 = vld [vmem:[%s234_s26] sm:$0x1]  ;;  %s229_s30 = sadd.s32 %s414_s29, %s629_s15 }
  0x13   : > { %v245_v3 = vmul.f32 0.0625, %v244_v2  ;;  %s415_s5 = sshll.u32 %s229_s30, 3 }
  0x14   : > { %s231_s8 = scalar_lea.vmem %s611_s0, %s415_s5  ;;  %s242_s11 = scalar_lea.vmem %s615_s4, %s415_s5 }
  0x15   : > { %v246_v4 = vpack.c.bf16 %v245_v3, %v245_v3  ;;  %v306_v18 = vld [vmem:[%s231_s8] sm:$0xff] }
  0x17   : > { %428 = vmatmul.mubr.msk.bf16.vlgmr.msra.gmra.mrb[0].mxu0 %vm256_vm1, %v246_v4 }
  0xea   : > { %v294_v6 = vpop.f32.mrb[0].mxu0 }
  0xeb   : > { %v295_v7 = vadd.f32 %v294_v6, %v249_v5  ;;  %v429_v8 = vpop.f32.mrb[1].mxu0 }
  0xec   : > { %v297_v9 = vpop.f32.mrb[2].mxu0 }
  0xed   : > { %v420_v10 = vmul.f32 -1.442695, %v295_v7  ;;  %v430_v11 = vpop.f32.mrb[3].mxu0 }
  0xef   : > { %474 = vpow2.f32 %v420_v10 }
  0xf9   : > { %v475_v12 = vpop.eup %474 }
  0xfa   : > { %v303_v13 = vadd.f32 1.0, %v475_v12 }
  0xfc   : > { %476 = vrcp.f32 %v303_v13 }
 0x106   : > { %v477_v17 = vpop.eup %476 }
 0x107   : > { %v310_v19 = vrot.slane %v477_v17, %v309_v16 }
 0x109   : > { %v311_v20 = vmul.f32 %v310_v19, %v306_v18 }
 0x10b   : > { %v312_v21 = vadd.f32 %v311_v20, %v310_v19 }
 0x10d   : > { %313 = vst.msk [vmem:[%s242_s11] sm:$0xff] %vm256_vm1, %v312_v21 }
 0x10e PF: > { %s14_s19 = sadd.s32 1, %s516_s19   ;;  %s616_s15 = smov %s508_s17 }
 0x10f   : > { %p11_p7 = scmp.ge.s32.totalorder %s14_s19, 6   ;;  %s617_s16 = smov %s512_s18 }
 0x110   : > { %s618_s17 = smov %s621_s20  ;;  %s619_s18 = smov %s625_s21 }
 0x111   :  { %13 = sbr.rel (!%p11_p7) target bundleno = 3 (0x3), region = 69 }

// kernel: resblock_forward.2
= control target key start
LH: loop header
LB: loop body
LE: loop exit
PB: predicated region body
PF: predicated region fallthrough
CT: control target
= control target key end

     0   :  { %s1265_s13 = smov 0   ;;  %s1267_s14 = smov 0   ;;  %s1461_s0 = inlined_call_operand.vmem [shape: f32[2,2,28,8], index: 0, kind: input, shape index: {}]   ;;  %s1462_s1 = inlined_call_operand.vmem [shape: f32[1,8], index: 1, kind: input, shape index: {}]   ;;  %s1463_s2 = inlined_call_operand.vmem [shape: f32[1,8], index: 2, kind: input, shape index: {}]   ;;  %s1464_s3 = inlined_call_operand.vmem [shape: bf16[24,16], index: 3, kind: input, shape index: {}]   ;;  %s1465_s4 = inlined_call_operand.vmem [shape: f32[1,16], index: 4, kind: input, shape index: {}]   ;;  %s1466_s5 = inlined_call_operand.vmem [shape: f32[1,16], index: 5, kind: input, shape index: {}]   ;;  %s1467_s6 = inlined_call_operand.vmem [shape: bf16[48,16], index: 6, kind: input, shape index: {}]   ;;  %s1468_s7 = inlined_call_operand.vmem [shape: f32[1,16], index: 7, kind: input, shape index: {}]   ;;  %s1469_s8 = inlined_call_operand.vmem [shape: bf16[8,16], index: 8, kind: input, shape index: {}]   ;;  %s1470_s9 = inlined_call_operand.vmem [shape: f32[2,16,16], index: 9, kind: output, shape index: {0}]   ;;  %s1471_s10 = inlined_call_operand.vmem [shape: f32[2,1,16], index: 10, kind: output, shape index: {1}]  }
   0x1   :  { %s1269_s15 = smov 0   ;;  %s1271_s16 = smov 0  }
   0x2   :  { %s1273_s17 = smov 0  }
   0x3 LB: > { %s30_s18 = sadd.s32 1, %s1196_s15  ;;  %s33_s19 = sadd.s32 1, %s1200_s16  ;;  %s1204_s17 = sphi %s1273_s17, %s21_s17   ;;  %s1200_s16 = sphi %s1271_s16, %s1493_s16   ;;  %s1196_s15 = sphi %s1269_s15, %s1492_s15   ;;  %s1192_s14 = sphi %s1267_s14, %s1491_s14   ;;  %s1188_s13 = sphi %s1265_s13, %s1490_s13  }
   0x4   : > { %p31_p0 = scmp.ge.s32.totalorder %s30_s18, 2  ;;  %p1016_p1 = scmp.ge.s32.totalorder %s1204_s17, 1 }
   0x5   : > { %p335_p2 = scmp.lt.s32.totalorder %s1204_s17, 5 }
   0x6   : > { %s1495_s18 = smov (%p31_p0, %s30_s18), 0  ;;  %s1497_s19 = smov (!%p31_p0, %s33_s19), %s1200_s16 }
   0x7   : > { %p336_p3 = pnand %p1016_p1, %p335_p2  ;;  %p35_p4 = scmp.ge.s32.totalorder %s1497_s19, 2 }
   0x8   : > { %p383_p5 = scmp.lt.s32.totalorder (!%p336_p3), %s1192_s14, 1  ;;  %p385_p6 = scmp.lt.s32.totalorder (!%p336_p3), %s1188_s13, 1  ;;  %v443_v0 = vlaneseq (!%p336_p3)  ;;  %v1022_v2 = vld [vmem:[%s1462_s1] ss:$0 sm:$0xff] (!%p336_p3)  ;;  %vm482_vm0 = vcmask (!%p336_p3), 1046528   ;;  %vm502_vm12 = vcmask (!%p336_p3), 1045504  }
   0x9   : > { %s1499_s19 = smov (%p35_p4, %s1497_s19), 0  ;;  %339 = sbr.rel (%p336_p3) target bundleno = 766 (0x2fe), region = 56 }
   0xa   : > { %1474 = sst [smem:[#allocation3_spill]] %s1499_s19  ;;  %v1300_v1 = vshrl.u32 (!%p336_p3), %v443_v0, 7  ;;  %v1023_v5 = vld [vmem:[%s1463_s2] ss:$0 sm:$0xff] (!%p336_p3)  ;;  %v1162_v32 = vld [vmem:[%s1464_s3 + $0x8] ss:$0 sps:$4 sm:$0xff] (!%p336_p3)  }
   0xb   : > { %v1161_v19 = vld [vmem:[%s1464_s3] sm:$0xff] (!%p336_p3)   ;;  %s1206_s28 = smov (!%p336_p3), 8   ;;  %s1207_s29 = smov (!%p336_p3), 16  }
   0xc   : > { %v1308_v3 = vadd.s32 (!%p336_p3), 8, %v1300_v1  ;;  %v1311_v4 = vadd.s32 (!%p336_p3), 16, %v1300_v1  ;;  %v1325_v6 = vadd.s32 (!%p336_p3), 24, %v1300_v1  ;;  %1055 = vmatprep.subr.bf16.mxu0 (!%p336_p3), %v1161_v19  ;;  %p1040_p7 = scmp.ne.s32.totalorder (!%p336_p3), %s1188_s13, 0 }
   0xd   : > { %1056 = vmatpush3.bf16.msra.mxu0 (!%p336_p3), %v1161_v19 }
  0x10   : > { %s1501_s14 = smov (!%p383_p5, %s1192_s14), 1 }
  0x11   : > { %s386_s21 = scalar_select %p385_p6, %s1188_s13, 1 }
  0x12   : > { %s1018_s22 = sshll.u32 %s1501_s14, 3  ;;  %s1020_s23 = sshll.u32 %s1501_s14, 1 }
  0x13   : > { %s1017_s24 = sshll.u32 %s386_s21, 2  ;;  %s1302_s25 = sadd.s32 %s1020_s23, %s386_s21 }
  0x14   : > { %s389_s26 = sadd.s32 %s1018_s22, %s1017_s24  ;;  %s1319_s21 = scalar_lea.vmem %s1471_s10, %s1501_s14 }
  0x15   : > { %s1019_s27 = sshll.u32 %s389_s26, 3  ;;  %s1475_s24 = smul.u32 24, %s1188_s13 }
  0x16   : > { %s391_s12 = scalar_lea.vmem %s1461_s0, %s1019_s27  ;;  %s1021_s23 = sshll.u32 %s1302_s25, 3 }
  0x17   : > { %v1327_v7 = vld [vmem:[%s391_s12] sm:$0xff]  ;;  %v1329_v8 = vld [vmem:[%s391_s12 + $0x8] sm:$0xff]  ;;  %v1331_v9 = vld [vmem:[%s391_s12 + $0x10] sm:$0xff]  ;;  %s1024_s26 = sadd.s32 4294967294, %s1475_s24  ;;  %s1476_s30 = smov %s1475_s24 }
  0x18   : > { %v416_v10 = vmul.f32 %v1022_v2, %v1327_v7  ;;  %v417_v11 = vmul.f32 %v1022_v2, %v1329_v8  ;;  %v418_v12 = vmul.f32 %v1022_v2, %v1331_v9  ;;  %v449_v13 = vstv %s1024_s26  ;;  %v1338_v14 = vld [vmem:[%s391_s12 + $0x18] sm:$0xf]  ;;  %s1031_s11 = sadd.s32 4294967295, %s1476_s30  ;;  %s1208_s12 = smov 32  }
  0x19   : > { %v450_v15 = vadd.s32 %v449_v13, %v1300_v1  ;;  %v451_v16 = vadd.s32 %v449_v13, %v1308_v3  ;;  %v452_v17 = vadd.s32 %v449_v13, %v1311_v4  ;;  %v419_v18 = vmul.f32 %v1022_v2, %v1338_v14  ;;  %s399_s14 = scalar_lea.vmem %s1470_s9, %s1021_s23 }
  0x1a   : > { %v427_v20 = vadd.f32 %v1023_v5, %v416_v10  ;;  %v428_v21 = vadd.f32 %v1023_v5, %v417_v11  ;;  %v429_v22 = vadd.f32 %v1023_v5, %v418_v12  ;;  %v453_v23 = vadd.s32 %v449_v13, %v1325_v6 }
  0x1b   : > { %vm454_vm1 = vcmp.ge.s32.totalorder %v450_v15, 0  ;;  %vm455_vm2 = vcmp.ge.s32.totalorder %v451_v16, 0  ;;  %vm456_vm3 = vcmp.ge.s32.totalorder %v452_v17, 0  ;;  %vm458_vm4 = vcmp.lt.s32.totalorder %v450_v15, 48 }
  0x1c   : > { %vm431_vm5 = vcmp.gt.f32.partialorder %v427_v20, 0.0  ;;  %vm432_vm6 = vcmp.gt.f32.partialorder %v428_v21, 0.0  ;;  %vm433_vm7 = vcmp.gt.f32.partialorder %v429_v22, 0.0  ;;  %v435_v24 = vmul.f32 0.01, %v427_v20  ;;  %vm462_vm8 = vmand %vm454_vm1, %vm458_vm4 }
  0x1d   : > { %v436_v25 = vmul.f32 0.01, %v428_v21  ;;  %v437_v26 = vmul.f32 0.01, %v429_v22  ;;  %vm459_vm9 = vcmp.lt.s32.totalorder %v451_v16, 48  ;;  %vm460_vm10 = vcmp.lt.s32.totalorder %v452_v17, 48 }
  0x1e   : > { %v439_v27 = vsel %vm431_vm5, %v427_v20, %v435_v24  ;;  %vm463_vm11 = vmand %vm455_vm2, %vm459_vm9  ;;  %v430_v28 = vadd.f32 %v1023_v5, %v419_v18  ;;  %vm457_vm13 = vcmp.ge.s32.totalorder %v453_v23, 0  ;;  %vm461_vm15 = vcmp.lt.s32.totalorder %v453_v23, 48  ;;  %v1029_v24 = vld [vmem:[%s1465_s4] ss:$0 sm:$0xff] }
  0x1f   : > { %v440_v29 = vsel %vm432_vm6, %v428_v21, %v436_v25  ;;  %v441_v30 = vsel %vm433_vm7, %v429_v22, %v437_v26  ;;  %vm464_vm14 = vmand %vm456_vm3, %vm460_vm10  ;;  %v474_v31 = vsel %vm462_vm8, %v439_v27, 0.0  ;;  %vm553_vm4 = vcmask 1043456  }
  0x20   : > { %v475_v33 = vsel %vm463_vm11, %v440_v29, 0.0  ;;  %v476_v34 = vsel %vm464_vm14, %v441_v30, 0.0  ;;  %v483_v35 = vrot.slane %v474_v31, 1  ;;  %v503_v36 = vrot.slane %v474_v31, 2  ;;  %vm465_vm2 = vmand %vm457_vm13, %vm461_vm15  ;;  %1085 = vmatprep.subr.msk.bf16.mxu0 %vm553_vm4, %v1162_v32  ;;  %v1030_v29 = vld [vmem:[%s1466_s5] ss:$0 sm:$0xff] }
  0x21   : > { %v484_v37 = vrot.slane %v475_v33, 1  ;;  %v486_v38 = vrot.slane %v476_v34, 1  ;;  %v504_v39 = vrot.slane %v475_v33, 2  ;;  %v506_v40 = vrot.slane %v476_v34, 2 }
  0x22   : > { %vm434_vm1 = vcmp.gt.f32.partialorder %v430_v28, 0.0  ;;  %v438_v41 = vmul.f32 0.01, %v430_v28  ;;  %v555_v50 = vsel %vm553_vm4, %v1162_v32, 0  ;;  %vm1473_vm3 = vcmask 64512  }
  0x23   : > { %v485_v42 = vsel %vm482_vm0, %v483_v35, %v484_v37  ;;  %v487_v43 = vsel %vm482_vm0, %v484_v37, %v486_v38  ;;  %v505_v44 = vsel %vm502_vm12, %v503_v36, %v504_v39  ;;  %v507_v45 = vsel %vm502_vm12, %v504_v39, %v506_v40  ;;  %1058 = vmatpush3.bf16.msra.mxu0 %v555_v50  ;;  %v1164_v37 = vld [vmem:[%s1467_s6 + $0x8] sm:$0xff]  }
  0x24   : > { %v1131_v46 = vpack.i.bf16 %v487_v43, %v485_v42  ;;  %v1141_v47 = vpack.i.bf16 %v507_v45, %v505_v44  ;;  %v442_v48 = vsel %vm434_vm1, %v430_v28, %v438_v41  ;;  %vm1472_vm5 = vcmask 130048   ;;  %v803_v43 = vld [vmem:[%s1469_s8] sm:$0xf] }
  0x25   : > { %v477_v49 = vsel %vm465_vm2, %v442_v48, 0.0  ;;  %vm546_vm6 = vcmask 195584   ;;  %v641_v23 = vstv %s1031_s11  ;;  %1086 = vmatprep.subr.msk.bf16.mxu0 %vm553_vm4, %v803_v43 }
  0x26   : > { %1132 = vrot.lane.b32.xlu0 %v1131_v46, %s1206_s28  ;;  %1142 = vrot.lane.b32.xlu1 %v1141_v47, %s1207_s29  ;;  %v488_v51 = vrot.slane %v477_v49, 1  ;;  %v508_v52 = vrot.slane %v477_v49, 2  ;;  %v644_v25 = vadd.s32 %v641_v23, %v1311_v4  ;;  %v642_v26 = vadd.s32 %v641_v23, %v1300_v1 }
  0x27   : > { %v645_v27 = vadd.s32 %v641_v23, %v1325_v6  ;;  %v643_v30 = vadd.s32 %v641_v23, %v1308_v3 }
  0x28   : > { %v489_v53 = vsel %vm482_vm0, %v486_v38, %v488_v51  ;;  %v509_v54 = vsel %vm502_vm12, %v506_v40, %v508_v52  ;;  %vm648_vm7 = vcmp.ge.s32.totalorder %v644_v25, 0  ;;  %vm652_vm8 = vcmp.lt.s32.totalorder %v644_v25, 48 }
  0x29   : > { %v1136_v55 = vpack.i.bf16 %v488_v51, %v489_v53  ;;  %v1146_v56 = vpack.i.bf16 %v508_v52, %v509_v54  ;;  %vm646_vm9 = vcmp.ge.s32.totalorder %v642_v26, 0  ;;  %vm650_vm10 = vcmp.lt.s32.totalorder %v642_v26, 48  ;;  %vm656_vm1 = vmand %vm648_vm7, %vm652_vm8 }
  0x2a   : > { %vm649_vm11 = vcmp.ge.s32.totalorder %v645_v27, 0  ;;  %vm647_vm13 = vcmp.ge.s32.totalorder %v643_v30, 0  ;;  %vm653_vm14 = vcmp.lt.s32.totalorder %v645_v27, 48  ;;  %vm651_vm2 = vcmp.lt.s32.totalorder %v643_v30, 48 }
  0x2b   : > { %1137 = vrot.lane.b32.xlu0 %v1136_v55, %s1206_s28  ;;  %1147 = vrot.lane.b32.xlu1 %v1146_v56, %s1207_s29  ;;  %vm657_vm7 = vmand %vm649_vm11, %vm653_vm14  ;;  %v801_v52 = vpack.c.bf16 %v1329_v8, %v1327_v7  ;;  %vm746_vm11 = vcmask 392192  }
  0x2d   : > { %v807_v7 = vrot.slane %v801_v52, 1 }
  0x98   : > { %v1133_v57 = vpop.permute.xlu0 %1132  ;;  %v1143_v58 = vpop.permute.xlu1 %1142 }
  0x99   : > { %v1135_v59 = vunpack.i.h.bf16 %v1133_v57  ;;  %v1134_v60 = vunpack.i.l.bf16 %v1133_v57  ;;  %v1145_v61 = vunpack.i.h.bf16 %v1143_v58  ;;  %v1144_v62 = vunpack.i.l.bf16 %v1143_v58 }
  0x9a   : > { %v817_v58 = vsel %vm553_vm4, %v803_v43, 0  ;;  %vm1479_vm4 = vcmask 64512  }
  0x9b   : > { %v523_v63 = vsel %vm1473_vm3, %v474_v31, %v1134_v60  ;;  %v524_v0 = vsel %vm1473_vm3, %v475_v33, %v1135_v59  ;;  %v1163_v31 = vld [vmem:[%s1467_s6] sm:$0xff]  }
  0x9c   : > { %v528_v2 = vsel %vm1472_vm5, %v523_v63, %v1144_v62  ;;  %v529_v5 = vsel %vm1472_vm5, %v524_v0, %v1145_v61  ;;  %1063 = vmatprep.subr.bf16.mxu1 %v1163_v31  ;;  %v802_v62 = vpack.c.bf16 %v1338_v14, %v1331_v9 }
  0x9d   : > { %v1138_v10 = vpop.permute.xlu0 %1137  ;;  %v1148_v11 = vpop.permute.xlu1 %1147  ;;  %v532_v12 = vpack.c.bf16 %v529_v5, %v528_v2  ;;  %1064 = vmatpush3.bf16.msra.mxu1 %v1163_v31 }
  0x9e   : > { %v1140_v13 = vunpack.i.h.bf16 %v1138_v10  ;;  %v1139_v15 = vunpack.i.l.bf16 %v1138_v10  ;;  %v1150_v16 = vunpack.i.h.bf16 %v1148_v11  ;;  %v1149_v17 = vunpack.i.l.bf16 %v1148_v11  ;;  %1065 = vmatprep.subr.bf16.mxu1 %v1164_v37 }
  0x9f   : > { %1059 = vmatprep.mubr.msk.bf16.mxu0 %vm546_vm6, %v532_v12  ;;  %v808_v12 = vrot.slane %v802_v62, 1 }
  0xa0   : > { %v526_v18 = vsel %vm1473_vm3, %v477_v49, %v1140_v13  ;;  %v525_v19 = vsel %vm1473_vm3, %v476_v34, %v1139_v15  ;;  %v1165_v49 = vld [vmem:[%s1467_s6 + $0x10] sm:$0xff]  }
  0xa1   : > { %v530_v20 = vsel %vm1472_vm5, %v525_v19, %v1149_v17  ;;  %v531_v21 = vsel %vm1472_vm5, %v526_v18, %v1150_v16  ;;  %vm1394_vm5 = vmand %vm646_vm9, %vm650_vm10  ;;  %1066 = vmatpush3.bf16.msra.mxu1 %v1164_v37  ;;  %v809_v14 = vsel %vm482_vm0, %v807_v7, %v808_v12  ;;  %vm1481_vm10 = vcmask 130048  }
  0xa2   : > { %v533_v22 = vpack.c.bf16 %v531_v21, %v530_v20  ;;  %vm655_vm9 = vmand %vm647_vm13, %vm651_vm2  ;;  %1067 = vmatprep.subr.bf16.mxu1 %v1165_v49  ;;  %vm885_vm2 = vcmask (!%p1040_p7), 122880  }
  0xa4   : > { %1060 = vmatmul.mubr.msk.bf16.vlgmr.msra.gmra.mrb[0].mxu0 %vm546_vm6, %v533_v22 }
  0xa5   : > { %1068 = vmatpush3.bf16.msra.mxu1 %v1165_v49  ;;  %1074 = vmatpush3.bf16.msra.mxu0 %v817_v58  ;;  %v1209_v49 = vmov (!%p1040_p7), 0.0  }
  0xa6   : > { %1075 = vmatprep.mubr.msk.bf16.mxu0 %vm1479_vm4, %v809_v14  ;;  %886 = vst.msk [vmem:[%s1319_s21] sm:$0x1] (!%p1040_p7), %vm885_vm2, %v1209_v49 }
 0x177   : > { %v1061_v28 = vpop.f32.mrb[0].mxu0 }
 0x178   : > { %v615_v32 = vmul.f32 %v1061_v28, %v1029_v24  ;;  %v591_v33 = vpop.f32.mrb[1].mxu0 }
 0x179   : > { %v613_v4 = vmul.f32 %v1029_v24, %v591_v33  ;;  %v1062_v1 = vpop.f32.mrb[2].mxu0 }
 0x17a   : > { %v626_v6 = vadd.f32 %v1030_v29, %v615_v32  ;;  %v616_v34 = vmul.f32 %v1062_v1, %v1029_v24  ;;  %v594_v35 = vpop.f32.mrb[3].mxu0 }
 0x17b   : > { %v624_v36 = vadd.f32 %v1030_v29, %v613_v4  ;;  %v614_v3 = vmul.f32 %v1029_v24, %v594_v35 }
 0x17c   : > { %vm630_vm15 = vcmp.gt.f32.partialorder %v626_v6, 0.0  ;;  %v634_v38 = vmul.f32 0.01, %v626_v6  ;;  %v627_v39 = vadd.f32 %v1030_v29, %v616_v34  ;;  %v1032_v34 = vld [vmem:[%s1468_s7] ss:$0 sm:$0xff] }
 0x17d   : > { %vm628_vm6 = vcmp.gt.f32.partialorder %v624_v36, 0.0  ;;  %v632_v40 = vmul.f32 0.01, %v624_v36  ;;  %v625_v42 = vadd.f32 %v1030_v29, %v614_v3 }
 0x17e   : > { %v638_v44 = vsel %vm630_vm15, %v626_v6, %v634_v38  ;;  %vm631_vm3 = vcmp.gt.f32.partialorder %v627_v39, 0.0  ;;  %v635_v45 = vmul.f32 0.01, %v627_v39 }
 0x17f   : > { %v668_v46 = vsel %vm656_vm1, %v638_v44, 0.0  ;;  %v636_v47 = vsel %vm628_vm6, %v624_v36, %v632_v40  ;;  %vm629_vm8 = vcmp.gt.f32.partialorder %v625_v42, 0.0  ;;  %v633_v48 = vmul.f32 0.01, %v625_v42 }
 0x180   : > { %v666_v50 = vsel %vm1394_vm5, %v636_v47, 0.0  ;;  %v639_v51 = vsel %vm631_vm3, %v627_v39, %v635_v45  ;;  %v677_v56 = vrot.slane %v668_v46, 1  ;;  %v693_v5 = vrot.slane %v668_v46, 2  ;;  %vm1480_vm3 = vmmov %vm1479_vm4 }
 0x181   : > { %v637_v53 = vsel %vm629_vm8, %v625_v42, %v633_v48  ;;  %v669_v54 = vsel %vm657_vm7, %v639_v51, 0.0  ;;  %v674_v59 = vrot.slane %v666_v50, 1  ;;  %v690_v10 = vrot.slane %v666_v50, 2  ;;  %1076 = vmatmul.mubr.msk.bf16.vlgmr.msra.gmra.mrb[4].mxu0 %vm1480_vm3, %v808_v12 }
 0x182   : > { %v667_v55 = vsel %vm655_vm9, %v637_v53, 0.0  ;;  %v679_v57 = vrot.slane %v669_v54, 1  ;;  %v695_v0 = vrot.slane %v669_v54, 2  ;;  %vm709_vm5 = vcmask 261120  }
 0x183   : > { %v675_v60 = vrot.slane %v667_v55, 1  ;;  %v691_v61 = vrot.slane %v667_v55, 2 }
 0x184   : > { %v680_v63 = vsel %vm482_vm0, %v677_v56, %v679_v57  ;;  %v696_v9 = vsel %vm502_vm12, %v693_v5, %v695_v0 }
 0x185   : > { %685 = vrot.lane.b32.xlu1 %v680_v63, %s1207_s29  ;;  %v676_v8 = vsel %vm482_vm0, %v674_v59, %v675_v60  ;;  %v678_v2 = vsel %vm482_vm0, %v675_v60, %v677_v56  ;;  %v692_v13 = vsel %vm502_vm12, %v690_v10, %v691_v61  ;;  %v694_v15 = vsel %vm502_vm12, %v691_v61, %v693_v5  ;;  %vm1482_vm0 = vmmov %vm1481_vm10 }
 0x186   : > { %v1151_v11 = vpack.i.bf16 %v678_v2, %v676_v8  ;;  %v1156_v16 = vpack.i.bf16 %v694_v15, %v692_v13  ;;  %vm1483_vm12 = vmmov %vm1482_vm0 }
 0x187   : > { %vm1484_vm13 = vmmov %vm1482_vm0 }
 0x188   : > { %1152 = vrot.lane.b32.xlu0 %v1151_v11, %s1207_s29  ;;  %vm1485_vm14 = vmmov %vm1482_vm0 }
 0x189   : > { %701 = vrot.lane.b32.xlu1 %v696_v9, %s1208_s12  ;;  %vm1486_vm15 = vmmov %vm1482_vm0 }
 0x18a   : > { %vm1487_vm1 = vmmov %vm1482_vm0 }
 0x18c   : > { %1157 = vrot.lane.b32.xlu0 %v1156_v16, %s1208_s12 }
 0x1f7   : > { %v686_v17 = vpop.permute.xlu1 %685 }
 0x1f8   : > { %v708_v23 = vsel %vm1481_vm10, %v668_v46, %v686_v17 }
 0x1fa   : > { %v1153_v18 = vpop.permute.xlu0 %1152 }
 0x1fb   : > { %v1155_v19 = vunpack.i.h.bf16 %v1153_v18  ;;  %v1154_v20 = vunpack.i.l.bf16 %v1153_v18  ;;  %v702_v21 = vpop.permute.xlu1 %701 }
 0x1fc   : > { %v712_v26 = vsel %vm709_vm5, %v708_v23, %v702_v21 }
 0x1fd   : > { %v706_v27 = vsel %vm1482_vm0, %v666_v50, %v1154_v20  ;;  %v707_v28 = vsel %vm1483_vm12, %v667_v55, %v1155_v19  ;;  %v714_v32 = vpack.c.bf16 %v712_v26, %v712_v26 }
 0x1fe   : > { %v1158_v22 = vpop.permute.xlu0 %1157 }
 0x1ff   : > { %v1160_v24 = vunpack.i.h.bf16 %v1158_v22  ;;  %v1159_v25 = vunpack.i.l.bf16 %v1158_v22 }
 0x201   : > { %v710_v29 = vsel %vm709_vm5, %v706_v27, %v1159_v25  ;;  %v711_v30 = vsel %vm709_vm5, %v707_v28, %v1160_v24 }
 0x202   : > { %v713_v31 = vpack.c.bf16 %v711_v30, %v710_v29 }
 0x204   : > { %1069 = vmatprep.mubr.msk.bf16.mxu1 %vm746_vm11, %v713_v31 }
 0x205   : > { %1070 = vmatmul.mubr.msk.bf16.vlgmr.msra.gmra.mrb[0].mxu1 %vm746_vm11, %v714_v32 }
 0x254   : > { %v1077_v33 = vpop.f32.mrb[4].mxu0 }
 0x255   : > { %v853_v4 = vpop.f32.mrb[5].mxu0 }
 0x256   : > { %v1078_v1 = vpop.f32.mrb[6].mxu0 }
 0x257   : > { %v856_v6 = vpop.f32.mrb[7].mxu0 }
 0x2d8   : > { %v1071_v35 = vpop.f32.mrb[0].mxu1 }
 0x2d9   : > { %v796_v36 = vadd.f32 %v1071_v35, %v1032_v34  ;;  %v787_v3 = vpop.f32.mrb[1].mxu1 }
 0x2da   : > { %v788_v37 = vadd.f32 %v1032_v34, %v787_v3  ;;  %v1072_v38 = vpop.f32.mrb[2].mxu1 }
 0x2db   : > { %v869_v39 = vadd.f32 %v1077_v33, %v796_v36  ;;  %v790_v40 = vpop.f32.mrb[3].mxu1 }
 0x2dc   : > { %v867_v41 = vadd.f32 %v853_v4, %v788_v37  ;;  %v791_v42 = vadd.f32 %v1032_v34, %v790_v40 }
 0x2dd   : > { %872 = vst.msk [vmem:[#allocation2 + $0x10] sm:$0xff] %vm1484_vm13, %v869_v39 }
 0x2de   : > { %870 = vst.msk [vmem:[#allocation2] sm:$0xff] %vm1485_vm14, %v867_v41  ;;  %v868_v43 = vadd.f32 %v856_v6, %v791_v42 }
 0x2e0   : > { %871 = vst.msk [vmem:[#allocation2 + $0x8] sm:$0xff] %vm1486_vm15, %v868_v43 }
 0x2e6   : > { %884 = sbr.rel (%p1040_p7) target bundleno = 749 (0x2ed), region = 60 }
 0x2e7   : > { %v873_v44 = vld [vmem:[#allocation2] ss:$3 sm:$0xff]  ;;  %v875_v45 = vld [vmem:[#allocation2 + $0x1] ss:$3 sm:$0xff]  ;;  %v877_v47 = vld [vmem:[#allocation2 + $0x2] ss:$3 sm:$0xff] }
 0x2e8   : > { %v878_v46 = vmax.f32 %v873_v44, %v875_v45 }
 0x2ea   : > { %v879_v48 = vmax.f32 %v878_v46, %v877_v47 }
 0x2ec   : > { %880 = vst.msk [vmem:[%s399_s14] sm:$0xff] %vm1487_vm1, %v879_v48 }
 0x2ed PF: > { %vm1488_vm6 = vcmask 130048   ;;  %v887_v56 = vld [vmem:[%s1319_s21] sm:$0x1]  ;;  %vm896_vm7 = vcmask 122880  }
 0x2ee   : > { %v888_v50 = vsel %vm1488_vm6, %v879_v48, 0.0 }
 0x2ef   : > { %v889_v51 = vrot.slane %v888_v50, 4 }
 0x2f1   : > { %v890_v52 = vadd.f32 %v889_v51, %v888_v50 }
 0x2f3   : > { %v891_v53 = vrot.slane %v890_v52, 2 }
 0x2f5   : > { %v892_v54 = vadd.f32 %v891_v53, %v890_v52 }
 0x2f7   : > { %v893_v55 = vrot.slane %v892_v54, 1 }
 0x2f9   : > { %v894_v57 = vadd.f32 %v893_v55, %v892_v54 }
 0x2fb   : > { %v895_v58 = vadd.f32 %v894_v57, %v887_v56 }
 0x2fd   : > { %897 = vst.msk [vmem:[%s1319_s21] sm:$0x1] %vm896_vm7, %v895_v58 }
 0x2fe PF: > { %s21_s17 = sadd.s32 1, %s1204_s17   ;;  %s1489_s25 = sld [smem:[#allocation3_spill]] }
 0x2ff   : > { %p18_p8 = scmp.ge.s32.totalorder %s21_s17, 6   ;;  %s1490_s13 = smov %s1196_s15 }
 0x300   : > { %s1491_s14 = smov %s1200_s16  ;;  %s1492_s15 = smov %s1495_s18 }
 0x301   :  { %20 = sbr.rel (!%p18_p8) target bundleno = 3 (0x3), region = 104 }
 0x304   : > { %s1493_s16 = smov %s1489_s25 }

</bundles_post_ra>
